<compile_context>
chip_gen: v5e
topology: v5e:2x2
jax: 0.10.0
libtpu: 0.0.40
codegen_flags: <defaults>
</compile_context>

<pallas_src>
import functools

import jax
import jax.numpy as jnp
from jax.experimental import pallas as pl
from jax.experimental.pallas import tpu as pltpu

_NEG_BIG = -1e30  # finite stand-in for -inf keeps the online softmax NaN-free
_SQRT_2_OVER_PI = 0.7978845608028654


def _gelu_tanh(x):
    # TODO(synk): PyTorch nn.GELU() default is the exact erf formulation; the tanh
    # approximation (max abs deviation ~1e-3) is used to stay on well-supported
    # EUP ops inside the kernel.
    return 0.5 * x * (1.0 + jnp.tanh(_SQRT_2_OVER_PI * (x + 0.044715 * x * x * x)))


def _attn_pool_kernel(tile_any_ref,                      # SMEM scalar-prefetch
                      x_ref, mask_ref, w1_ref, vec_ref,  # inputs
                      o_ref,                             # output
                      m_sc, l_sc, acc_sc,                # VMEM scratch
                      *, seq_len, matmul_dtype):
    b_idx = pl.program_id(0)
    s_idx = pl.program_id(1)
    n_s = pl.num_programs(1)
    ts, hid = x_ref.shape

    @pl.when(s_idx == 0)
    def _init():
        m_sc[...] = jnp.full_like(m_sc, _NEG_BIG)
        l_sc[...] = jnp.zeros_like(l_sc)
        acc_sc[...] = jnp.zeros_like(acc_sc)

    # Skip the whole MLP + softmax update for tiles with no valid token
    # (fully padded / fully masked) — the flag was scalar-prefetched into SMEM.
    @pl.when(tile_any_ref[b_idx * n_s + s_idx] > 0)
    def _compute():
        # validity = user attention_mask AND inside the real sequence extent
        # (the tail tile of the un-padded x may read out-of-bounds garbage).
        row_pos = s_idx * ts + jax.lax.broadcasted_iota(jnp.int32, (ts, 1), 0)
        valid = (mask_ref[...] != 0.0) & (row_pos < seq_len)          # (ts, 1)

        # Zero invalid rows once; reused for the matmul and the weighted sum so
        # garbage in the OOB tail can never poison the accumulators.
        x_nat = jnp.where(valid, x_ref[...], 0)                       # native dtype
        x_f32 = x_nat.astype(jnp.float32)

        vec = vec_ref[...]                                            # (4, hid) f32
        b1 = vec[0:1, :]
        gamma = vec[1:2, :]
        beta = vec[2:3, :]
        w2 = vec[3:4, :]

        # ---- per-token score MLP: Linear -> LayerNorm -> GELU -> Linear ----
        # MXU matmul in matmul_dtype (bf16 by default), f32 accumulation.
        h1 = jnp.dot(x_nat.astype(matmul_dtype), w1_ref[...],
                     preferred_element_type=jnp.float32) + b1          # (ts, hid)
        inv_h = 1.0 / hid
        mu = jnp.sum(h1, axis=-1, keepdims=True) * inv_h
        # var = E[x^2] - mu^2: single-pass, no centered temporary, and the two
        # lane reductions are independent so they can overlap the MXU.
        var = jnp.maximum(
            jnp.sum(h1 * h1, axis=-1, keepdims=True) * inv_h - mu * mu, 0.0)
        y = (h1 - mu) * jax.lax.rsqrt(var + 1e-5) * gamma + beta
        act = _gelu_tanh(y)
        # Second Linear's bias is omitted: softmax over S is shift-invariant.
        scores = jnp.sum(act * w2, axis=-1, keepdims=True)             # (ts, 1)
        scores = jnp.where(valid, scores, _NEG_BIG)

        # ---- online softmax over the tiled sequence axis ----
        m_prev = m_sc[...]                                             # (1, 1)
        m_new = jnp.maximum(m_prev, jnp.max(scores, axis=0, keepdims=True))
        alpha = jnp.exp(m_prev - m_new)
        p = jnp.exp(scores - m_new)                                    # (ts, 1)
        l_sc[...] = alpha * l_sc[...] + jnp.sum(p, axis=0, keepdims=True)
        # NOTE: kept as a VPU/XLU sublane reduce (known-good lowering); at small H
        # an MXU dot of p^T @ x would free the VALU slot (perf-neutral when
        # MXU-bound), left as-is for robustness.
        acc_sc[...] = alpha * acc_sc[...] + jnp.sum(p * x_f32, axis=0, keepdims=True)
        m_sc[...] = m_new

    @pl.when(s_idx == n_s - 1)
    def _finalize():
        inv_l = pl.reciprocal(l_sc[...], approx=False)
        o_ref[...] = (acc_sc[...] * inv_l).astype(o_ref.dtype)


def prepare_attention_pooling_params(w1, b1, ln_gamma, ln_beta, w2, b2=None, *,
                                     matmul_dtype=jnp.bfloat16):
    """One-time weight preprocessing (transpose + cast + stack).

    Hoisted out of the hot path so repeated forward calls don't re-materialize
    the HxH transpose / casts in HBM.

    w1: (H, H) torch Linear weight (out, in); b1, ln_gamma, ln_beta: (H,)
    w2: (1, H) torch Linear weight; b2 unused (softmax over S is shift-invariant).
    """
    del b2
    w1t = jnp.asarray(w1, jnp.float32).T.astype(matmul_dtype)   # used as x @ w1t
    vecs = jnp.stack([
        jnp.asarray(b1, jnp.float32).reshape(-1),
        jnp.asarray(ln_gamma, jnp.float32).reshape(-1),
        jnp.asarray(ln_beta, jnp.float32).reshape(-1),
        jnp.asarray(w2, jnp.float32).reshape(-1),
    ], axis=0)                                                  # (4, H) f32
    return w1t, vecs


def attention_pooling_forward(last_hidden_state, attention_mask, w1t, vecs, *,
                              seq_tile=512):
    """Pallas forward of AttentionPooling given pre-processed weights."""
    B, S, H = last_hidden_state.shape
    x = last_hidden_state
    matmul_dtype = w1t.dtype

    x_it = jnp.dtype(x.dtype).itemsize
    w_it = jnp.dtype(matmul_dtype).itemsize

    # ---- generation-aware VMEM budget ----
    try:
        vmem_cap = int(pltpu.get_tpu_info().vmem_capacity_bytes)
    except Exception:
        vmem_cap = 64 << 20                 # conservative fallback (v7x per-TC)
    budget = int(vmem_cap * 0.8)            # headroom for compiler-internal scratch

    def _est(t):
        return (2 * t * H * x_it            # double-buffered x tiles
                + 2 * t * 128 * 4           # mask tiles (lane-padded (t,1) f32)
                + 2 * H * H * w_it          # W1 (pipeline-buffered)
                + 2 * 8 * H * 4             # stacked b1/gamma/beta/w2
                + 5 * t * H * 4             # in-kernel f32 temporaries
                + (2 << 20))

    # ---- pick the sequence tile (no physical padding of x along S) ----
    ts = min(int(seq_tile), S)
    while _est(ts) > budget and ts > 16:
        ts //= 2
    if ts < S:
        ts = max(16, (ts // 16) * 16)       # bf16-safe sublane granularity
    else:
        ts = S                              # single full-extent tile (always legal)
    n_tiles = -(-S // ts)

    mask = jnp.asarray(attention_mask).astype(jnp.float32)       # (B, S)
    mask3 = mask.reshape(B, S, 1)

    # Per-(batch, seq-tile) "any valid token" flags, scalar-prefetched into SMEM
    # so fully-masked tiles can be skipped in-kernel.
    sp = n_tiles * ts
    mask_p = mask if sp == S else jnp.pad(mask, ((0, 0), (0, sp - S)))
    tile_any = (mask_p.reshape(B, n_tiles, ts) != 0).any(axis=-1)
    tile_any = tile_any.reshape(-1).astype(jnp.int32)             # (B * n_tiles,)

    grid_spec = pltpu.PrefetchScalarGridSpec(
        num_scalar_prefetch=1,
        grid=(B, n_tiles),
        in_specs=[
            pl.BlockSpec((None, ts, H), lambda b, s, t: (b, s, 0)),   # x tile
            pl.BlockSpec((None, ts, 1), lambda b, s, t: (b, s, 0)),   # mask tile
            pl.BlockSpec((H, H), lambda b, s, t: (0, 0)),             # W1 (resident)
            pl.BlockSpec((4, H), lambda b, s, t: (0, 0)),             # b1/gamma/beta/w2
        ],
        out_specs=pl.BlockSpec((None, 1, H), lambda b, s, t: (b, 0, 0)),
        scratch_shapes=[
            pltpu.VMEM((1, 1), jnp.float32),    # running max
            pltpu.VMEM((1, 1), jnp.float32),    # running softmax denominator
            pltpu.VMEM((1, H), jnp.float32),    # running weighted sum
        ],
    )

    out = pl.pallas_call(
        functools.partial(_attn_pool_kernel, seq_len=S, matmul_dtype=matmul_dtype),
        out_shape=jax.ShapeDtypeStruct((B, 1, H), jnp.float32),
        grid_spec=grid_spec,
        compiler_params=pltpu.CompilerParams(
            dimension_semantics=("parallel", "arbitrary"),
            vmem_limit_bytes=budget,
        ),
    )(tile_any, x, mask3, w1t, vecs)

    return out[:, 0, :]


def attention_pooling(last_hidden_state, hidden_states, attention_mask,
                      w1, b1, ln_gamma, ln_beta, w2, b2, *, seq_tile=512,
                      matmul_dtype=jnp.bfloat16):
    """Convenience wrapper matching the PyTorch module signature.

    For repeated inference calls, use prepare_attention_pooling_params once and
    call attention_pooling_forward directly.
    """
    del hidden_states  # accepted for signature parity; unused by the forward pass
    w1t, vecs = prepare_attention_pooling_params(
        w1, b1, ln_gamma, ln_beta, w2, b2, matmul_dtype=matmul_dtype)
    return attention_pooling_forward(last_hidden_state, attention_mask, w1t, vecs,
                                     seq_tile=seq_tile)


def reference_attention_pooling(x, mask, w1, b1, ln_gamma, ln_beta, w2, b2,
                                matmul_dtype=jnp.float32):
    """Pure-JAX reference mirroring the kernel's compute dtypes."""
    w1t = jnp.asarray(w1, jnp.float32).T.astype(matmul_dtype)
    h = jnp.dot(x.astype(matmul_dtype), w1t,
                preferred_element_type=jnp.float32) + jnp.asarray(b1, jnp.float32)
    mu = jnp.mean(h, axis=-1, keepdims=True)
    var = jnp.mean((h - mu) ** 2, axis=-1, keepdims=True)
    h = (h - mu) * jax.lax.rsqrt(var + 1e-5) * ln_gamma + ln_beta
    h = _gelu_tanh(h)
    w = jnp.dot(h, jnp.asarray(w2, jnp.float32).T) + b2
    w = jnp.where(mask[..., None] != 0, w, -jnp.inf)
    w = jax.nn.softmax(w, axis=1)
    return jnp.sum(w * x.astype(jnp.float32), axis=1)


if __name__ == "__main__":
    def run_case(key, B, S, H, seq_tile, x_dtype, matmul_dtype, tol):
        ks = jax.random.split(key, 7)
        x = jax.random.normal(ks[0], (B, S, H), jnp.float32).astype(x_dtype)
        hidden_states = (x,)  # unused by the forward pass (parity with the module)
        lengths = jax.random.randint(ks[1], (B, 1), 1, S + 1)  # >=1 valid token/row
        mask = (jax.lax.broadcasted_iota(jnp.int32, (B, S), 1) < lengths).astype(jnp.float32)
        w1 = 0.1 * jax.random.normal(ks[2], (H, H), jnp.float32)
        b1 = 0.1 * jax.random.normal(ks[3], (H,), jnp.float32)
        ln_gamma = 1.0 + 0.1 * jax.random.normal(ks[4], (H,), jnp.float32)
        ln_beta = 0.1 * jax.random.normal(ks[5], (H,), jnp.float32)
        w2 = 0.2 * jax.random.normal(ks[6], (1, H), jnp.float32)
        b2 = jnp.array([0.05], jnp.float32)

        out = attention_pooling(x, hidden_states, mask, w1, b1, ln_gamma, ln_beta,
                                w2, b2, seq_tile=seq_tile, matmul_dtype=matmul_dtype)
        out = jax.block_until_ready(out)
        ref = reference_attention_pooling(x, mask, w1, b1, ln_gamma, ln_beta, w2, b2,
                                          matmul_dtype=matmul_dtype)
        assert out.shape == (B, H)
        err = float(jnp.max(jnp.abs(out - ref)))
        assert jnp.allclose(out, ref, atol=tol, rtol=tol), (
            f"mismatch vs reference: max|diff|={err}")

    key = jax.random.PRNGKey(0)
    k1, k2, k3 = jax.random.split(key, 3)
    # Shapes implied by the module: last_hidden_state [B, S, H], attention_mask [B, S].
    # 1) single full-extent seq tile, f32 MXU path
    run_case(k1, B=2, S=8, H=32, seq_tile=128,
             x_dtype=jnp.float32, matmul_dtype=jnp.float32, tol=2e-2)
    # 2) multi-tile online softmax, ragged mask, partial (OOB) tail tile, bf16 MXU
    run_case(k2, B=3, S=300, H=96, seq_tile=128,
             x_dtype=jnp.float32, matmul_dtype=jnp.bfloat16, tol=2e-2)
    # 3) bf16 activations end-to-end, partial tail tile at ts=256
    run_case(k3, B=2, S=640, H=128, seq_tile=256,
             x_dtype=jnp.bfloat16, matmul_dtype=jnp.bfloat16, tol=2e-2)
    print("KERNEL_OK")
</pallas_src>

<mosaic_0001>
module attributes {stable_mosaic.version = 11 : i64} {
  func.func @_attn_pool_kernel(%arg0: i32, %arg1: i32, %arg2: memref<2xi32, #tpu.memory_space<smem>>, %arg3: memref<1x8x32xf32, #tpu.memory_space<vmem>>, %arg4: memref<1x8x1xf32, #tpu.memory_space<vmem>>, %arg5: memref<32x32xf32, #tpu.memory_space<vmem>>, %arg6: memref<4x32xf32, #tpu.memory_space<vmem>>, %arg7: memref<1x1x32xf32, #tpu.memory_space<vmem>>, %arg8: memref<1x1xf32, #tpu.memory_space<vmem>>, %arg9: memref<1x1xf32, #tpu.memory_space<vmem>>, %arg10: memref<1x32xf32, #tpu.memory_space<vmem>>) attributes {dimension_semantics = [#tpu.dimension_semantics<parallel>, #tpu.dimension_semantics<arbitrary>], iteration_bounds = array<i64: 2, 1>, scalar_prefetch = 1 : i64, scratch_operands = 3 : i64, tpu.core_type = #tpu.core_type<tc>, window_params = [{transform_indices = @transform_0, window_bounds = array<i64: 1, 8, 32>}, {transform_indices = @transform_1, window_bounds = array<i64: 1, 8, 1>}, {pipeline_mode = #tpu.pipeline_mode<synchronous>, transform_indices = @transform_2, window_bounds = array<i64: 32, 32>}, {pipeline_mode = #tpu.pipeline_mode<synchronous>, transform_indices = @transform_3, window_bounds = array<i64: 4, 32>}, {transform_indices = @transform_4, window_bounds = array<i64: 1, 1, 32>}]} {
    %c0_i32 = arith.constant 0 : i32
    %0 = arith.cmpi eq, %arg1, %c0_i32 : i32
    %1 = arith.extui %0 : i1 to i32
    %c0_i32_0 = arith.constant 0 : i32
    %2 = arith.cmpi ne, %1, %c0_i32_0 : i32
    scf.if %2 {
      %cst = arith.constant -1.000000e+30 : f32
      %13 = vector.broadcast %cst : f32 to vector<1x1xf32>
      %c0 = arith.constant 0 : index
      %c0_5 = arith.constant 0 : index
      %14 = vector.load %arg8[%c0, %c0_5] : memref<1x1xf32, #tpu.memory_space<vmem>>, vector<1x1xf32>
      tpu.vector_store %arg8[%c0, %c0_5], %13 {strides = array<i32>} : memref<1x1xf32, #tpu.memory_space<vmem>>, vector<1x1xf32>,
      %cst_6 = arith.constant 0.000000e+00 : f32
      %15 = vector.broadcast %cst_6 : f32 to vector<1x1xf32>
      %c0_7 = arith.constant 0 : index
      %c0_8 = arith.constant 0 : index
      %16 = vector.load %arg9[%c0_7, %c0_8] : memref<1x1xf32, #tpu.memory_space<vmem>>, vector<1x1xf32>
      tpu.vector_store %arg9[%c0_7, %c0_8], %15 {strides = array<i32>} : memref<1x1xf32, #tpu.memory_space<vmem>>, vector<1x1xf32>,
      %cst_9 = arith.constant 0.000000e+00 : f32
      %17 = vector.broadcast %cst_9 : f32 to vector<1x32xf32>
      %c0_10 = arith.constant 0 : index
      %c0_11 = arith.constant 0 : index
      %18 = vector.load %arg10[%c0_10, %c0_11] : memref<1x32xf32, #tpu.memory_space<vmem>>, vector<1x32xf32>
      tpu.vector_store %arg10[%c0_10, %c0_11], %17 {strides = array<i32>} : memref<1x32xf32, #tpu.memory_space<vmem>>, vector<1x32xf32>,
    } else {
    }
    %c1_i32 = arith.constant 1 : i32
    %3 = arith.muli %arg0, %c1_i32 : i32
    %4 = arith.addi %3, %arg1 : i32
    %5 = arith.index_cast %4 : i32 to index
    %6 = memref.load %arg2[%5] : memref<2xi32, #tpu.memory_space<smem>>
    %c0_i32_1 = arith.constant 0 : i32
    %7 = arith.cmpi sgt, %6, %c0_i32_1 : i32
    %8 = arith.extui %7 : i1 to i32
    %c0_i32_2 = arith.constant 0 : i32
    %9 = arith.cmpi ne, %8, %c0_i32_2 : i32
    scf.if %9 {
      %c8_i32 = arith.constant 8 : i32
      %13 = arith.muli %arg1, %c8_i32 : i32
      %14 = tpu.iota {dimensions = array<i32: 0>} : vector<8x1xi32>
      %15 = vector.broadcast %13 : i32 to vector<8x1xi32>
      %16 = arith.addi %15, %14 : vector<8x1xi32>
      %c0 = arith.constant 0 : index
      %c0_5 = arith.constant 0 : index
      %c0_6 = arith.constant 0 : index
      %17 = vector.load %arg4[%c0, %c0_5, %c0_6] : memref<1x8x1xf32, #tpu.memory_space<vmem>>, vector<1x8x1xf32>
      %18 = vector.shape_cast %17 : vector<1x8x1xf32> to vector<8x1xf32>
      %cst = arith.constant 0.000000e+00 : f32
      %19 = vector.broadcast %cst : f32 to vector<8x1xf32>
      %20 = arith.cmpf one, %18, %19 : vector<8x1xf32>
      %c8_i32_7 = arith.constant 8 : i32
      %21 = vector.broadcast %c8_i32_7 : i32 to vector<8x1xi32>
      %22 = arith.cmpi slt, %16, %21 : vector<8x1xi32>
      %23 = arith.andi %20, %22 : vector<8x1xi1>
      %c0_8 = arith.constant 0 : index
      %c0_9 = arith.constant 0 : index
      %c0_10 = arith.constant 0 : index
      %24 = vector.load %arg3[%c0_8, %c0_9, %c0_10] : memref<1x8x32xf32, #tpu.memory_space<vmem>>, vector<1x8x32xf32>
      %25 = vector.shape_cast %24 : vector<1x8x32xf32> to vector<8x32xf32>
      %c0_i32_11 = arith.constant 0 : i32
      %26 = arith.sitofp %c0_i32_11 : i32 to f32
      %27 = vector.shape_cast %23 : vector<8x1xi1> to vector<8x1xi1>
      %28 = vector.broadcast %27 : vector<8x1xi1> to vector<8x32xi1>
      %29 = vector.broadcast %26 : f32 to vector<8x32xf32>
      %30 = arith.select %28, %25, %29 : vector<8x32xi1>, vector<8x32xf32>
      %c0_12 = arith.constant 0 : index
      %c0_13 = arith.constant 0 : index
      %31 = vector.load %arg6[%c0_12, %c0_13] : memref<4x32xf32, #tpu.memory_space<vmem>>, vector<4x32xf32>
      %32 = vector.extract_strided_slice %31 {offsets = [0, 0], sizes = [1, 32], strides = [1, 1]} : vector<4x32xf32> to vector<1x32xf32>
      %33 = vector.extract_strided_slice %31 {offsets = [1, 0], sizes = [1, 32], strides = [1, 1]} : vector<4x32xf32> to vector<1x32xf32>
      %34 = vector.extract_strided_slice %31 {offsets = [2, 0], sizes = [1, 32], strides = [1, 1]} : vector<4x32xf32> to vector<1x32xf32>
      %35 = vector.extract_strided_slice %31 {offsets = [3, 0], sizes = [1, 32], strides = [1, 1]} : vector<4x32xf32> to vector<1x32xf32>
      %c0_14 = arith.constant 0 : index
      %c0_15 = arith.constant 0 : index
      %36 = vector.load %arg5[%c0_14, %c0_15] : memref<32x32xf32, #tpu.memory_space<vmem>>, vector<32x32xf32>
      %cst_16 = arith.constant dense<0.000000e+00> : vector<8x32xf32>
      %37 = tpu.matmul %30, %36, %cst_16 {dimension_numbers = #tpu.dot_dimension_numbers<[1], [0], [0], [1], [0, 0, 1, 1], [], []>} : vector<8x32xf32>, vector<32x32xf32>, vector<8x32xf32> -> vector<8x32xf32>
      %38 = vector.broadcast %32 : vector<1x32xf32> to vector<8x32xf32>
      %39 = arith.addf %37, %38 : vector<8x32xf32>
      %cst_17 = arith.constant dense<0.000000e+00> : vector<8xf32>
      %40 = vector.multi_reduction <add>, %39, %cst_17 [1] : vector<8x32xf32> to vector<8xf32>
      %41 = vector.shape_cast %40 : vector<8xf32> to vector<8x1xf32>
      %cst_18 = arith.constant 3.125000e-02 : f32
      %42 = vector.broadcast %cst_18 : f32 to vector<8x1xf32>
      %43 = arith.mulf %41, %42 : vector<8x1xf32>
      %44 = arith.mulf %39, %39 : vector<8x32xf32>
      %cst_19 = arith.constant dense<0.000000e+00> : vector<8xf32>
      %45 = vector.multi_reduction <add>, %44, %cst_19 [1] : vector<8x32xf32> to vector<8xf32>
      %46 = vector.shape_cast %45 : vector<8xf32> to vector<8x1xf32>
      %cst_20 = arith.constant 3.125000e-02 : f32
      %47 = vector.broadcast %cst_20 : f32 to vector<8x1xf32>
      %48 = arith.mulf %46, %47 : vector<8x1xf32>
      %49 = arith.mulf %43, %43 : vector<8x1xf32>
      %50 = arith.subf %48, %49 : vector<8x1xf32>
      %cst_21 = arith.constant 0.000000e+00 : f32
      %51 = vector.broadcast %cst_21 : f32 to vector<8x1xf32>
      %52 = arith.maximumf %50, %51 : vector<8x1xf32>
      %53 = vector.broadcast %43 : vector<8x1xf32> to vector<8x32xf32>
      %54 = arith.subf %39, %53 : vector<8x32xf32>
      %cst_22 = arith.constant 9.99999974E-6 : f32
      %55 = vector.broadcast %cst_22 : f32 to vector<8x1xf32>
      %56 = arith.addf %52, %55 : vector<8x1xf32>
      %57 = math.rsqrt %56 : vector<8x1xf32>
      %58 = vector.broadcast %57 : vector<8x1xf32> to vector<8x32xf32>
      %59 = arith.mulf %54, %58 : vector<8x32xf32>
      %60 = vector.broadcast %33 : vector<1x32xf32> to vector<8x32xf32>
      %61 = arith.mulf %59, %60 : vector<8x32xf32>
      %62 = vector.broadcast %34 : vector<1x32xf32> to vector<8x32xf32>
      %63 = arith.addf %61, %62 : vector<8x32xf32>
      %cst_23 = arith.constant 5.000000e-01 : f32
      %64 = vector.broadcast %cst_23 : f32 to vector<8x32xf32>
      %65 = arith.mulf %64, %63 : vector<8x32xf32>
      %cst_24 = arith.constant 4.471500e-02 : f32
      %66 = vector.broadcast %cst_24 : f32 to vector<8x32xf32>
      %67 = arith.mulf %66, %63 : vector<8x32xf32>
      %68 = arith.mulf %67, %63 : vector<8x32xf32>
      %69 = arith.mulf %68, %63 : vector<8x32xf32>
      %70 = arith.addf %63, %69 : vector<8x32xf32>
      %cst_25 = arith.constant 0.797884583 : f32
      %71 = vector.broadcast %cst_25 : f32 to vector<8x32xf32>
      %72 = arith.mulf %71, %70 : vector<8x32xf32>
      %73 = math.tanh %72 : vector<8x32xf32>
      %cst_26 = arith.constant 1.000000e+00 : f32
      %74 = vector.broadcast %cst_26 : f32 to vector<8x32xf32>
      %75 = arith.addf %74, %73 : vector<8x32xf32>
      %76 = arith.mulf %65, %75 : vector<8x32xf32>
      %77 = vector.broadcast %35 : vector<1x32xf32> to vector<8x32xf32>
      %78 = arith.mulf %76, %77 : vector<8x32xf32>
      %cst_27 = arith.constant dense<0.000000e+00> : vector<8xf32>
      %79 = vector.multi_reduction <add>, %78, %cst_27 [1] : vector<8x32xf32> to vector<8xf32>
      %80 = vector.shape_cast %79 : vector<8xf32> to vector<8x1xf32>
      %cst_28 = arith.constant -1.000000e+30 : f32
      %81 = vector.broadcast %cst_28 : f32 to vector<8x1xf32>
      %82 = arith.select %23, %80, %81 : vector<8x1xi1>, vector<8x1xf32>
      %c0_29 = arith.constant 0 : index
      %c0_30 = arith.constant 0 : index
      %83 = vector.load %arg8[%c0_29, %c0_30] : memref<1x1xf32, #tpu.memory_space<vmem>>, vector<1x1xf32>
      %cst_31 = arith.constant dense<0xFF800000> : vector<1xf32>
      %84 = vector.multi_reduction <maximumf>, %82, %cst_31 [0] : vector<8x1xf32> to vector<1xf32>
      %85 = vector.shape_cast %84 : vector<1xf32> to vector<1x1xf32>
      %86 = arith.maximumf %83, %85 : vector<1x1xf32>
      %87 = arith.subf %83, %86 : vector<1x1xf32>
      %88 = math.exp %87 : vector<1x1xf32>
      %89 = vector.broadcast %86 : vector<1x1xf32> to vector<8x1xf32>
      %90 = arith.subf %82, %89 : vector<8x1xf32>
      %91 = math.exp %90 : vector<8x1xf32>
      %c0_32 = arith.constant 0 : index
      %c0_33 = arith.constant 0 : index
      %92 = vector.load %arg9[%c0_32, %c0_33] : memref<1x1xf32, #tpu.memory_space<vmem>>, vector<1x1xf32>
      %93 = arith.mulf %88, %92 : vector<1x1xf32>
      %cst_34 = arith.constant dense<0.000000e+00> : vector<1xf32>
      %94 = vector.multi_reduction <add>, %91, %cst_34 [0] : vector<8x1xf32> to vector<1xf32>
      %95 = vector.shape_cast %94 : vector<1xf32> to vector<1x1xf32>
      %96 = arith.addf %93, %95 : vector<1x1xf32>
      %c0_35 = arith.constant 0 : index
      %c0_36 = arith.constant 0 : index
      %97 = vector.load %arg9[%c0_35, %c0_36] : memref<1x1xf32, #tpu.memory_space<vmem>>, vector<1x1xf32>
      tpu.vector_store %arg9[%c0_35, %c0_36], %96 {strides = array<i32>} : memref<1x1xf32, #tpu.memory_space<vmem>>, vector<1x1xf32>,
      %c0_37 = arith.constant 0 : index
      %c0_38 = arith.constant 0 : index
      %98 = vector.load %arg10[%c0_37, %c0_38] : memref<1x32xf32, #tpu.memory_space<vmem>>, vector<1x32xf32>
      %99 = vector.broadcast %88 : vector<1x1xf32> to vector<1x32xf32>
      %100 = arith.mulf %99, %98 : vector<1x32xf32>
      %101 = vector.broadcast %91 : vector<8x1xf32> to vector<8x32xf32>
      %102 = arith.mulf %101, %30 : vector<8x32xf32>
      %cst_39 = arith.constant dense<0.000000e+00> : vector<32xf32>
      %103 = vector.multi_reduction <add>, %102, %cst_39 [0] : vector<8x32xf32> to vector<32xf32>
      %104 = vector.shape_cast %103 : vector<32xf32> to vector<1x32xf32>
      %105 = arith.addf %100, %104 : vector<1x32xf32>
      %c0_40 = arith.constant 0 : index
      %c0_41 = arith.constant 0 : index
      %106 = vector.load %arg10[%c0_40, %c0_41] : memref<1x32xf32, #tpu.memory_space<vmem>>, vector<1x32xf32>
      tpu.vector_store %arg10[%c0_40, %c0_41], %105 {strides = array<i32>} : memref<1x32xf32, #tpu.memory_space<vmem>>, vector<1x32xf32>,
      %c0_42 = arith.constant 0 : index
      %c0_43 = arith.constant 0 : index
      %107 = vector.load %arg8[%c0_42, %c0_43] : memref<1x1xf32, #tpu.memory_space<vmem>>, vector<1x1xf32>
      tpu.vector_store %arg8[%c0_42, %c0_43], %86 {strides = array<i32>} : memref<1x1xf32, #tpu.memory_space<vmem>>, vector<1x1xf32>,
    } else {
    }
    %c0_i32_3 = arith.constant 0 : i32
    %10 = arith.cmpi eq, %arg1, %c0_i32_3 : i32
    %11 = arith.extui %10 : i1 to i32
    %c0_i32_4 = arith.constant 0 : i32
    %12 = arith.cmpi ne, %11, %c0_i32_4 : i32
    scf.if %12 {
      %c0 = arith.constant 0 : index
      %c0_5 = arith.constant 0 : index
      %13 = vector.load %arg9[%c0, %c0_5] : memref<1x1xf32, #tpu.memory_space<vmem>>, vector<1x1xf32>
      %14 = tpu.reciprocal %13 : vector<1x1xf32> -> vector<1x1xf32>
      %c0_6 = arith.constant 0 : index
      %c0_7 = arith.constant 0 : index
      %15 = vector.load %arg10[%c0_6, %c0_7] : memref<1x32xf32, #tpu.memory_space<vmem>>, vector<1x32xf32>
      %16 = vector.broadcast %14 : vector<1x1xf32> to vector<1x32xf32>
      %17 = arith.mulf %15, %16 : vector<1x32xf32>
      %c0_8 = arith.constant 0 : index
      %c0_9 = arith.constant 0 : index
      %c0_10 = arith.constant 0 : index
      %18 = vector.load %arg7[%c0_8, %c0_9, %c0_10] : memref<1x1x32xf32, #tpu.memory_space<vmem>>, vector<1x1x32xf32>
      %19 = vector.shape_cast %18 : vector<1x1x32xf32> to vector<1x32xf32>
      %20 = vector.shape_cast %17 : vector<1x32xf32> to vector<1x1x32xf32>
      tpu.vector_store %arg7[%c0_8, %c0_9, %c0_10], %20 {strides = array<i32>} : memref<1x1x32xf32, #tpu.memory_space<vmem>>, vector<1x1x32xf32>,
    } else {
    }
    return
  }
  func.func @transform_0(%arg0: i32, %arg1: i32, %arg2: memref<2xi32, #tpu.memory_space<smem>>) -> (i32, i32, i32) {
    %c0_i32 = arith.constant 0 : i32
    %c0_i32_0 = arith.constant 0 : i32
    return %arg0, %arg1, %c0_i32 : i32, i32, i32
  }
  func.func @transform_1(%arg0: i32, %arg1: i32, %arg2: memref<2xi32, #tpu.memory_space<smem>>) -> (i32, i32, i32) {
    %c0_i32 = arith.constant 0 : i32
    %c0_i32_0 = arith.constant 0 : i32
    return %arg0, %arg1, %c0_i32 : i32, i32, i32
  }
  func.func @transform_2(%arg0: i32, %arg1: i32, %arg2: memref<2xi32, #tpu.memory_space<smem>>) -> (i32, i32) {
    %c0_i32 = arith.constant 0 : i32
    %c0_i32_0 = arith.constant 0 : i32
    %c0_i32_1 = arith.constant 0 : i32
    return %c0_i32, %c0_i32_0 : i32, i32
  }
  func.func @transform_3(%arg0: i32, %arg1: i32, %arg2: memref<2xi32, #tpu.memory_space<smem>>) -> (i32, i32) {
    %c0_i32 = arith.constant 0 : i32
    %c0_i32_0 = arith.constant 0 : i32
    %c0_i32_1 = arith.constant 0 : i32
    return %c0_i32, %c0_i32_0 : i32, i32
  }
  func.func @transform_4(%arg0: i32, %arg1: i32, %arg2: memref<2xi32, #tpu.memory_space<smem>>) -> (i32, i32, i32) {
    %c0_i32 = arith.constant 0 : i32
    %c0_i32_0 = arith.constant 0 : i32
    %c0_i32_1 = arith.constant 0 : i32
    return %arg0, %c0_i32, %c0_i32_0 : i32, i32, i32
  }
}

</mosaic_0001>

<bundles_post_ra>
// kernel: tpu_custom_call.1
= control target key start
LH: loop header
LB: loop body
LE: loop exit
PB: predicated region body
PF: predicated region fallthrough
CT: control target
= control target key end

     0   :  { %s791_s21 = smov [#allocation6]   ;;  %s972_s0 = inlined_call_operand.hbm [shape: s32[2], index: 0, kind: input, shape index: {}]   ;;  %s973_s1 = inlined_call_operand.vmem [shape: f32[2,8,32], index: 1, kind: input, shape index: {}]   ;;  %s974_s2 = inlined_call_operand.vmem [shape: f32[2,8,1], index: 2, kind: input, shape index: {}]   ;;  %s975_s3 = inlined_call_operand.hbm [shape: f32[32,32], index: 3, kind: input, shape index: {}]   ;;  %s976_s4 = inlined_call_operand.vmem [shape: f32[4,32], index: 4, kind: input, shape index: {}]   ;;  %s977_s5 = inlined_call_operand.hbm [shape: f32[2,1,32], index: 5, kind: output, shape index: {}]  }
   0x1   :  { %s11_s20 = sshll.u32 %s972_s0, 4  ;;  %s12_s20 = int_to_ptr.hbm [resolvable:$true] %s11_s20 }
   0x2   :  { %14 = dma.hbm_to_smem %s12_s20, 16, %s791_s21, [#allocation5] }
   0x3   :  { %757 = dma.done.wait [#allocation5], 16 }
   0x4   :  { %758 = vsyncadd [#allocation5], 4294967280 }
   0x5   :  { %17 = sfence }
   0x6   :  { %18 = vsyncpa [#allocation8], 0 }
   0x7   :  { %19 = vsyncpa [#allocation9], 0 }
   0x8   :  { %21 = vsyncpa [#allocation9 + $0x1], 0  ;;  %s832_s22 = smov 0   ;;  %s834_s23 = smov 0  }
   0x9   :  { %s836_s24 = smov 0   ;;  %s838_s25 = smov 0  }
   0xa   :  { %s840_s26 = smov 0   ;;  %s842_s0 = smov 0  }
   0xb LB: > { %s564_s27 = sadd.s32 4294967295, %s789_s0   ;;  %s565_s28 = sadd.s32 4294967294, %s789_s0   ;;  %s789_s0 = sphi %s842_s0, %s27_s0   ;;  %s785_s26 = sphi %s840_s26, %s984_s26   ;;  %s781_s25 = sphi %s838_s25, %s983_s25   ;;  %s777_s24 = sphi %s836_s24, %s982_s24   ;;  %s773_s23 = sphi %s834_s23, %s981_s23   ;;  %s769_s22 = sphi %s832_s22, %s980_s22  }
   0xc   : > { %s39_s29 = sadd.s32 1, %s785_s26  ;;  %s144_s30 = sadd.s32 1, %s777_s24 }
   0xd   : > { %p41_p0 = scmp.ge.s32.totalorder %s39_s29, 2  ;;  %p154_p1 = scmp.ne.s32.totalorder %s777_s24, %s773_s23 }
   0xe   : > { %p155_p2 = scmp.eq.s32.totalorder %s564_s27, 1  ;;  %p160_p3 = scmp.ne.s32.totalorder %s773_s23, %s769_s22 }
   0xf   : > { %s986_s29 = smov (%p41_p0, %s39_s29), 0  ;;  %p161_p5 = scmp.eq.s32.totalorder %s565_s28, 1 }
  0x10   : > { %p872_p4 = por %p155_p2, %p154_p1  ;;  %s141_s7 = ssub.s32 %s785_s26, %s986_s29 }
  0x11   : > { %p566_p6 = scmp.ge.s32.totalorder %s789_s0, 1  ;;  %p142_p7 = scmp.eq.s32.totalorder %s141_s7, 0 }
  0x12   : > { %p879_p8 = por %p161_p5, %p160_p3  ;;  %p168_p9 = scmp.lt.s32.totalorder %s789_s0, 3 }
  0x13   : > { %s885_s9 = scalar_select %p142_p7, %s777_s24, %s144_s30  }
  0x14   : > { %p169_p10 = pnand %p566_p6, %p168_p9  ;;  %p591_p11 = scmp.eq.s32.totalorder %s564_s27, 0 }
  0x15   : > { %s179_s12 = sshll.u32 %s975_s3, 4  ;;  %s792_s13 = smov [#allocation7]   ;;  %s180_s12 = int_to_ptr.hbm [resolvable:$true] %s179_s12 }
  0x16   : > { %p583_p12 = pneg %p169_p10  ;;  %s181_s14 = sshll.u32 %s792_s13, 4  ;;  %s182_s14 = int_to_ptr.vmem [resolvable:$true] %s181_s14 }
  0x17   : > { %s793_s15 = smov 128   ;;  %s794_s16 = smov 8  }
  0x18   : > { %p584_p13 = pnand %p591_p11, %p583_p12  ;;  %220 = sbr.rel (%p169_p10) target bundleno = 861 (0x35d), region = 36 }
  0x1a   : > { %586 = dma.hbm_to_vmem [thread:$0]  (!%p584_p13), %s180_s12, 512, %s182_s14, [#allocation8], %s793_s15, %s793_s15, %s794_s16  }
  0x1d   : > { %760 = dma.done.wait (%p591_p11), [#allocation8], 512  }
  0x1e   : > { %762 = vsyncadd (%p591_p11), [#allocation8], 4294966784  ;;  %s253_s17 = sand.u32 1, %s773_s23   ;;  %p255_p0 = scmp.lt.s32.totalorder %s781_s25, 1  ;;  %vm273_vm0 = vcmask 0   ;;  %v795_v0 = vmov 0.0  }
  0x1f   : > { %s279_s18 = sld [smem:[#allocation6 + %s781_s25]]  ;;  %275 = vst.msk [vmem:[#allocation3] sm:$0x1] %vm273_vm0, %v795_v0  ;;  %v796_v1 = vmov -1e+30   ;;  %vm276_vm1 = vcmask 253952  }
  0x20   : > { %s256_s19 = scalar_select %p255_p0, %s781_s25, 1  ;;  %274 = vst.msk [vmem:[#allocation2] sm:$0x1] %vm273_vm0, %v796_v1 }
  0x21   : > { %277 = vst.msk [vmem:[#allocation4] sm:$0x1] %vm276_vm1, %v795_v0  ;;  %s905_s11 = scalar_lea.vmem [#allocation10], %s253_s17 }
  0x22   : > { %s571_s20 = sshll.u32 %s256_s19, 3 }
  0x23   : > { %s261_s28 = scalar_lea.vmem %s973_s1, %s571_s20  ;;  %s268_s10 = scalar_lea.vmem %s974_s2, %s571_s20 }
  0x25   : > { %p573_p1 = scmp.le.s32.totalorder %s279_s18, 0 }
  0x27   : > { %283 = sbr.rel (%p573_p1) target bundleno = 721 (0x2d1), region = 48 }
  0x2c   : > { %v907_v2 = vld [vmem:[%s268_s10] sm:$0xff]  ;;  %v303_v4 = vld [vmem:[#allocation7 + $0x10] sm:$0xff]  ;;  %v797_v5 = vmov 0   ;;  %v302_v7 = vld [vmem:[#allocation7 + $0x8] sm:$0xff]  ;;  %vm306_vm3 = vcmask 261120   ;;  %vm375_vm8 = vcmask 7168  }
  0x2d   : > { %v304_v3 = vld [vmem:[#allocation7 + $0x18] sm:$0xff]  ;;  %650 = vset.pattern.permute.xlu0 %v797_v5  ;;  %vm290_vm2 = vcmp.ne.f32.partialorder %v907_v2, 0.0  ;;  %651 = vset.pattern.permute.xlu2 %v797_v5  ;;  %v301_v8 = vld [vmem:[#allocation7] sm:$0xff] }
  0x2e   : > { %322 = vmatpush.msra.mxu0 %v304_v3  ;;  %v294_v6 = vsel %vm290_vm2, 1, %v797_v5  ;;  %v293_v9 = vld [vmem:[%s261_s28] sm:$0xff] }
  0x2f   : > { %296 = vperm.xlu0 %650, %v294_v6   ;;  %v300_v12 = vld [vmem:[%s976_s4] sm:$0xf] }
  0x30   : > { %323 = vmatpush.msra.mxu0 %v303_v4  ;;  %v305_v13 = vperm.slane %v300_v12, 0  ;;  %v355_v33 = vperm.slane %v300_v12, 1  ;;  %v357_v36 = vperm.slane %v300_v12, 2  ;;  %v368_v48 = vperm.slane %v300_v12, 3  ;;  %v374_v60 = vld [vmem:[#allocation2] sm:$0x1] }
  0x31   : > { %v393_v12 = vld [vmem:[#allocation3] sm:$0x1] }
  0x32   : > { %324 = vmatpush.msra.mxu0 %v302_v7 }
  0x34   : > { %325 = vmatpush.msra.mxu0 %v301_v8 }
  0xa1   : > { %v297_v10 = vpop.permute.xlu0 %296 }
  0xa2   : > { %vm298_vm4 = vcmp.eq.s32.totalorder %v297_v10, 1 }
  0xa3   : > { %v912_v11 = vsel %vm298_vm4, %v293_v9, 0.0 }
  0xa4   : > { %574 = vmatmul.msk.f32.vlgmr.msra.gmra.mxu0 %vm306_vm3, %v912_v11 }
 0x121   : > { %v327_v14 = vpop.f32.mrf.mxu0 }
 0x122   : > { %v328_v15 = vadd.f32 %v327_v14, %v305_v13 }
 0x124   : > { %v330_v16 = vsel %vm306_vm3, %v328_v15, 0.0  ;;  %v334_v17 = vmul.f32 %v328_v15, %v328_v15 }
 0x125   : > { %331 = vadd.xlane.f32.xlu0 %v330_v16 }
 0x126   : > { %v335_v18 = vsel %vm306_vm3, %v334_v17, 0.0 }
 0x127   : > { %336 = vadd.xlane.f32.xlu1 %v335_v18 }
 0x198   : > { %v332_v19 = vpop.xlane.xlu0 %331 }
 0x199   : > { %v333_v20 = vmul.f32 0.03125, %v332_v19 }
 0x19a   : > { %v337_v21 = vpop.xlane.xlu1 %336 }
 0x19b   : > { %v339_v22 = vmul.f32 %v333_v20, %v333_v20  ;;  %v338_v23 = vmul.f32 0.03125, %v337_v21  ;;  %v342_v34 = vsub.f32 %v328_v15, %v333_v20 }
 0x19d   : > { %v340_v24 = vsub.f32 %v338_v23, %v339_v22 }
 0x19f   : > { %v341_v25 = vmax.f32 %v340_v24, 0.0 }
 0x1a1   : > { %v343_v26 = vadd.f32 1e-05, %v341_v25 }
 0x1a3   : > { %652 = vrsqrt.f32 %v343_v26  ;;  %vm350_vm6 = vweird.f32 %v343_v26 }
 0x1a9   : > { %v653_v27 = vpop.eup %652 }
 0x1aa   : > { %v345_v28 = vmul.f32 %v653_v27, %v343_v26  ;;  %vm351_vm5 = vweird.f32 %v653_v27  ;;  %v405_v26 = vld [vmem:[#allocation4] sm:$0x1] }
 0x1ab   : > { %vm352_vm7 = vmor %vm350_vm6, %vm351_vm5 }
 0x1ac   : > { %v346_v29 = vmul.f32 %v653_v27, %v345_v28 }
 0x1ae   : > { %v347_v30 = vmul.f32 0.5, %v346_v29 }
 0x1b0   : > { %v348_v31 = vsub.f32 1.5, %v347_v30 }
 0x1b2   : > { %v349_v32 = vmul.f32 %v653_v27, %v348_v31 }
 0x1b4   : > { %v353_v35 = vsel %vm352_vm7, %v653_v27, %v349_v32 }
 0x1b5   : > { %v354_v37 = vmul.f32 %v353_v35, %v342_v34 }
 0x1b7   : > { %v356_v38 = vmul.f32 %v355_v33, %v354_v37 }
 0x1b9   : > { %v358_v39 = vadd.f32 %v357_v36, %v356_v38 }
 0x1bb   : > { %v360_v40 = vmul.f32 0.044715, %v358_v39  ;;  %v359_v46 = vmul.f32 0.5, %v358_v39 }
 0x1bd   : > { %v361_v41 = vmul.f32 %v360_v40, %v358_v39 }
 0x1bf   : > { %v362_v42 = vmul.f32 %v361_v41, %v358_v39 }
 0x1c1   : > { %v363_v43 = vadd.f32 %v362_v42, %v358_v39 }
 0x1c3   : > { %v364_v44 = vmul.f32 0.7978846, %v363_v43 }
 0x1c5   : > { %654 = vtanh.f32 %v364_v44 }
 0x1cb   : > { %v655_v45 = vpop.eup %654 }
 0x1cc   : > { %v366_v47 = vadd.f32 1.0, %v655_v45 }
 0x1ce   : > { %v367_v49 = vmul.f32 %v366_v47, %v359_v46 }
 0x1d0   : > { %v369_v50 = vmul.f32 %v368_v48, %v367_v49 }
 0x1d2   : > { %v370_v51 = vsel %vm306_vm3, %v369_v50, 0.0 }
 0x1d3   : > { %371 = vadd.xlane.f32.xlu1 %v370_v51 }
 0x246   : > { %v372_v52 = vpop.xlane.xlu1 %371 }
 0x247   : > { %v373_v53 = vsel %vm290_vm2, %v372_v52, -1e+30 }
 0x248   : > { %v376_v54 = vsel %vm375_vm8, %v373_v53, -inf }
 0x249   : > { %v377_v55 = vrot.slane %v376_v54, 4 }
 0x24b   : > { %v378_v56 = vmax.f32 %v376_v54, %v377_v55 }
 0x24d   : > { %v379_v57 = vrot.slane %v378_v56, 2 }
 0x24f   : > { %v380_v58 = vmax.f32 %v378_v56, %v379_v57 }
 0x251   : > { %v381_v59 = vrot.slane %v380_v58, 1 }
 0x253   : > { %v382_v61 = vmax.f32 %v380_v58, %v381_v59 }
 0x255   : > { %v383_v62 = vmax.f32 %v374_v60, %v382_v61 }
 0x257   : > { %v388_v63 = vperm.slane %v383_v62, 0  ;;  %429 = vst.msk [vmem:[#allocation2] sm:$0x1] %vm273_vm0, %v383_v62  ;;  %v384_v3 = vsub.f32 %v374_v60, %v383_v62 }
 0x259   : > { %v390_v0 = vsub.f32 %v373_v53, %v388_v63  ;;  %v385_v4 = vmul.f32 1.442695, %v384_v3 }
 0x25b   : > { %v391_v1 = vmul.f32 1.442695, %v390_v0 }
 0x25d   : > { %656 = vpow2.f32 %v391_v1 }
 0x25e   : > { %658 = vpow2.f32 %v385_v4 }
 0x263   : > { %v657_v2 = vpop.eup %656 }
 0x264   : > { %v395_v5 = vsel %vm375_vm8, %v657_v2, 0.0  ;;  %415 = vperm.xlu2 %651, %v657_v2   ;;  %v659_v9 = vpop.eup %658 }
 0x265   : > { %v396_v6 = vrot.slane %v395_v5, 4  ;;  %v394_v14 = vmul.f32 %v659_v9, %v393_v12 }
 0x267   : > { %v397_v7 = vadd.f32 %v396_v6, %v395_v5 }
 0x269   : > { %v398_v8 = vrot.slane %v397_v7, 2 }
 0x26b   : > { %v399_v10 = vadd.f32 %v398_v8, %v397_v7 }
 0x26c   : > { %408 = vperm.xlu2 %651, %v659_v9  }
 0x26d   : > { %v400_v13 = vrot.slane %v399_v10, 1 }
 0x26f   : > { %v401_v15 = vadd.f32 %v400_v13, %v399_v10 }
 0x271   : > { %v402_v16 = vadd.f32 %v401_v15, %v394_v14 }
 0x273   : > { %404 = vst.msk [vmem:[#allocation3] sm:$0x1] %vm273_vm0, %v402_v16 }
 0x2be   : > { %v416_v17 = vpop.permute.xlu2 %415 }
 0x2bf   : > { %v418_v18 = vmul.f32 %v416_v17, %v912_v11 }
 0x2c1   : > { %v419_v19 = vsel %vm306_vm3, %v418_v18, 0.0 }
 0x2c2   : > { %v420_v20 = vrot.slane %v419_v19, 4 }
 0x2c4   : > { %v421_v21 = vadd.f32 %v420_v20, %v419_v19 }
 0x2c6   : > { %v422_v22 = vrot.slane %v421_v21, 2  ;;  %v409_v23 = vpop.permute.xlu2 %408 }
 0x2c7   : > { %v411_v25 = vperm.slane %v409_v23, 0 }
 0x2c8   : > { %v423_v24 = vadd.f32 %v422_v22, %v421_v21 }
 0x2c9   : > { %v412_v29 = vmul.f32 %v411_v25, %v405_v26 }
 0x2ca   : > { %v424_v27 = vrot.slane %v423_v24, 1 }
 0x2cc   : > { %v425_v28 = vadd.f32 %v424_v27, %v423_v24 }
 0x2ce   : > { %v426_v30 = vadd.f32 %v425_v28, %v412_v29 }
 0x2d0   : > { %428 = vst.msk [vmem:[#allocation4] sm:$0x1] %vm276_vm1, %v426_v30 }
 0x2d1 PF: > { %v433_v31 = vld [vmem:[#allocation3] sm:$0x1]  ;;  %v798_v32 = vmov 0   ;;  %s467_s16 = scalar_lea.hbm %s977_s5, %s781_s25  ;;  %s469_s18 = sshll.u32 %s905_s11, 4  ;;  %s470_s18 = int_to_ptr.vmem [resolvable:$true] %s469_s18 }
 0x2d2   : > { %660 = vset.pattern.permute.xlu0 %v798_v32  ;;  %661 = vrcp.f32 %v433_v31  ;;  %v445_v34 = vand.u32 2147483648, %v433_v31  ;;  %vm439_vm9 = vweird.f32 %v433_v31  ;;  %v443_v36 = vand.u32 2147483647, %v433_v31  ;;  %s471_s19 = sshll.u32 %s467_s16, 4  ;;  %s459_s20 = scalar_lea.sflag [#allocation9], %s253_s17  ;;  %s472_s19 = int_to_ptr.hbm [resolvable:$true] %s471_s19 }
 0x2d3   : > { %s719_s21 = sshra.s32 %s472_s19, 4  ;;  %s725_s30 = scalar_lea.hbm %s977_s5, 2  ;;  %s720_s21 = int_to_ptr.hbm [resolvable:$true] %s719_s21 }
 0x2d4   : > { %v446_v38 = vor.u32 1.1754944e-38, %v445_v34  ;;  %vm444_vm12 = vcmp.eq.f32.partialorder %v443_v36, 8.507059e+37  ;;  %s721_s27 = scalar_lea.hbm %s720_s21, 1  ;;  %p726_p6 = scmp.lt.s32.totalorder %s720_s21, %s977_s5 }
 0x2d5   : > { %p722_p2 = scmp.ne.s32.totalorder %s720_s21, %s721_s27  ;;  %p727_p7 = scmp.lt.s32.totalorder %s725_s30, %s721_s27 }
 0x2d7   : > { %v448_v42 = vld [vmem:[#allocation4] sm:$0x1]  ;;  %p723_p3 = pnand %p722_p2, %p872_p4  ;;  %p728_p9 = por %p727_p7, %p726_p6 }
 0x2d8   : > { %v662_v11 = vpop.eup %661 }
 0x2d9   : > { %v435_v33 = vmul.f32 %v662_v11, %v433_v31  ;;  %vm440_vm10 = vweird.f32 %v662_v11  ;;  %p724_p5 = pneg %p723_p3 }
 0x2da   : > { %vm441_vm11 = vmor %vm439_vm9, %vm440_vm10 }
 0x2db   : > { %v436_v35 = vsub.f32 1.0, %v435_v33  ;;  %p729_p10 = pnand %p728_p9, %p724_p5 }
 0x2dd   : > { %v437_v37 = vmul.f32 %v662_v11, %v436_v35 }
 0x2df   : > { %v438_v39 = vadd.f32 %v662_v11, %v437_v37 }
 0x2e1   : > { %v442_v40 = vsel %vm441_vm11, %v662_v11, %v438_v39 }
 0x2e2   : > { %v447_v41 = vsel %vm444_vm12, %v446_v38, %v442_v40 }
 0x2e3   : > { %451 = vperm.xlu0 %660, %v447_v41  }
 0x355   : > { %v452_v43 = vpop.permute.xlu0 %451 }
 0x356   : > { %v454_v44 = vperm.slane %v452_v43, 0 }
 0x358   : > { %v455_v45 = vmul.f32 %v454_v44, %v448_v42 }
 0x35a   : > { %457 = vst.msk [vmem:[%s905_s11] sm:$0x1] %vm276_vm1, %v455_v45 }
 0x35b   : > { %732 = shalt.err (!%p729_p10)
}
 0x35c   : > { %581 = dma.vmem_to_hbm [thread:$0]  (%p872_p4), %s470_s18, 16, %s472_s19, %s459_s20  }
 0x35d PF: > { %p593_p11 = scmp.ge.s32.totalorder %s789_s0, 2  ;;  %s483_s17 = sand.u32 1, %s769_s22  }
 0x35e   : > { %s484_s11 = scalar_lea.sflag [#allocation9], %s483_s17 }
 0x35f   : > { %p588_p12 = pnand %p593_p11, %p879_p8 }
 0x361   : > { %p589_p13 = pneg %p588_p12 }
 0x363   : > { %764 = dma.done.wait (%p589_p13), %s484_s11, 16  }
 0x364   : > { %766 = vsyncadd (%p589_p13), %s484_s11, 4294967280  ;;  %s27_s0 = sadd.s32 1, %s789_s0   ;;  %s980_s22 = smov %s773_s23 }
 0x365   : > { %p24_p0 = scmp.ge.s32.totalorder %s27_s0, 4   ;;  %s981_s23 = smov %s777_s24 }
 0x366   : > { %s982_s24 = smov %s885_s9  ;;  %s983_s25 = smov %s785_s26 }
 0x367   : > { %s984_s26 = smov %s986_s29  ;;  %26 = sbr.rel (!%p24_p0) target bundleno = 11 (0xb), region = 91 }
 0x36c   :  { %489 = vsyncpa [#allocation8], 1 }
 0x36d   :  { %491 = vsyncpa [#allocation8 + $0x1], 1 }
 0x36e   :  { %492 = vsyncpa [#allocation9], 1 }
 0x36f   :  { %494 = vsyncpa [#allocation9 + $0x1], 1 }

</bundles_post_ra>
